<compile_context>
chip_gen: v5e
topology: v5e:2x2
jax: 0.10.0
libtpu: 0.0.40
codegen_flags: <defaults>
</compile_context>

<pallas_src>
import jax
import jax.numpy as jnp
from jax.experimental import pallas as pl
from jax.experimental.pallas import tpu as pltpu

LANE = 128
INPUT_SIZE = 21 * 3 * 2    # 126
OUTPUT_SIZE = 21 * 3       # 63
LAYER_DIMS = [(INPUT_SIZE, 100), (100, 100), (100, 100),
              (100, 64), (64, 64), (64, OUTPUT_SIZE)]


def _mlp_kernel(x_ref,
                w1_ref, b1_ref, w2_ref, b2_ref, w3_ref, b3_ref,
                w4_ref, b4_ref, w5_ref, b5_ref, w6_ref, b6_ref,
                o_ref):
    """Fused 5x(Linear+ReLU) + Linear on one (TB, 128) batch tile."""

    def linear(h, w_ref, b_ref):
        # bf16 MXU operands, fp32 accumulation; bias add stays fp32 on the VPU.
        y = jnp.dot(h.astype(jnp.bfloat16), w_ref[...],
                    preferred_element_type=jnp.float32)
        return y + b_ref[...]

    h = x_ref[...]                                     # (TB, 128) fp32
    h = jnp.maximum(linear(h, w1_ref, b1_ref), 0.0)
    h = jnp.maximum(linear(h, w2_ref, b2_ref), 0.0)
    h = jnp.maximum(linear(h, w3_ref, b3_ref), 0.0)
    h = jnp.maximum(linear(h, w4_ref, b4_ref), 0.0)
    h = jnp.maximum(linear(h, w5_ref, b5_ref), 0.0)
    o_ref[...] = linear(h, w6_ref, b6_ref).astype(o_ref.dtype)


def mlp_forward(x, params_pad):
    """x: (B, 126) float32.  params_pad: 6 pairs of (bf16 (128,128) W, fp32 (1,128) b)."""
    B, F = x.shape
    assert F == INPUT_SIZE, F

    # Batch tile: multiple of 8 sublanes, capped at 128 rows per MXU pass.
    TB = 128 if B >= 128 else ((B + 7) // 8) * 8
    B_pad = ((B + TB - 1) // TB) * TB
    grid = (B_pad // TB,)

    # Lane- and sublane-pad the input once outside the kernel.
    x_pad = jnp.zeros((B_pad, LANE), x.dtype).at[:B, :F].set(x)

    flat_args = [x_pad]
    in_specs = [pl.BlockSpec((TB, LANE), lambda i: (i, 0))]
    for (w, b) in params_pad:
        flat_args += [w, b]
        # Full-array blocks with a constant index map: weights/biases stay
        # resident in VMEM and are not re-DMA'd across batch tiles.
        in_specs += [pl.BlockSpec(w.shape, lambda i: (0, 0)),
                     pl.BlockSpec(b.shape, lambda i: (0, 0))]

    flops = 2 * B_pad * len(params_pad) * LANE * LANE
    bytes_accessed = (
        x_pad.size * x_pad.dtype.itemsize            # input
        + B_pad * LANE * 4                           # output (fp32)
        + sum(w.size * w.dtype.itemsize + b.size * b.dtype.itemsize
              for (w, b) in params_pad))             # weights + biases

    out_pad = pl.pallas_call(
        _mlp_kernel,
        out_shape=jax.ShapeDtypeStruct((B_pad, LANE), jnp.float32),
        grid=grid,
        in_specs=in_specs,
        out_specs=pl.BlockSpec((TB, LANE), lambda i: (i, 0)),
        compiler_params=pltpu.CompilerParams(
            dimension_semantics=("parallel",),        # shard batch tiles on v7x's 2 TCs
            vmem_limit_bytes=32 * 1024 * 1024),       # safe budget on v5e/v6e/v7x
        cost_estimate=pl.CostEstimate(
            flops=flops, transcendentals=0, bytes_accessed=bytes_accessed),
    )(*flat_args)

    return out_pad[:B, :OUTPUT_SIZE]


def init_params(key):
    """Returns (fp32 unpadded params, lane-padded bf16-weight params)."""
    params_f32 = []
    params_pad = []
    for (fan_in, fan_out) in LAYER_DIMS:
        key, kw, kb = jax.random.split(key, 3)
        bound = 1.0 / (fan_in ** 0.5)   # PyTorch nn.Linear default uniform bound
        w = jax.random.uniform(kw, (fan_in, fan_out), jnp.float32, -bound, bound)
        b = jax.random.uniform(kb, (fan_out,), jnp.float32, -bound, bound)
        params_f32.append((w, b))
        w_pad = jnp.zeros((LANE, LANE), jnp.float32).at[:fan_in, :fan_out].set(w)
        b_pad = jnp.zeros((1, LANE), jnp.float32).at[0, :fan_out].set(b)
        params_pad.append((w_pad.astype(jnp.bfloat16), b_pad))
    return params_f32, params_pad


def mlp_reference_matched(x, params_pad):
    """Pure-JAX reference with the exact kernel math (padded lanes, bf16 MXU ops)."""
    B, F = x.shape
    h = jnp.zeros((B, LANE), jnp.float32).at[:, :F].set(x)
    n = len(params_pad)
    for i, (w, b) in enumerate(params_pad):
        y = jnp.dot(h.astype(jnp.bfloat16), w,
                    preferred_element_type=jnp.float32) + b
        h = jnp.maximum(y, 0.0) if i < n - 1 else y
    return h[:, :OUTPUT_SIZE]


def mlp_reference_fp32(x, params_f32):
    """Full-precision semantic reference (original PyTorch forward)."""
    h = x
    for (w, b) in params_f32[:-1]:
        h = jnp.maximum(h @ w + b, 0.0)
    w, b = params_f32[-1]
    return h @ w + b


if __name__ == "__main__":
    key = jax.random.PRNGKey(0)
    key, kx = jax.random.split(key)
    params_f32, params_pad = init_params(key)

    # Small batch: single (8, 128) tile.
    B = 8
    x = jax.random.normal(kx, (B, INPUT_SIZE), jnp.float32)
    out = jax.block_until_ready(mlp_forward(x, params_pad))
    assert out.shape == (B, OUTPUT_SIZE), out.shape
    ref = mlp_reference_matched(x, params_pad)
    assert jnp.allclose(out, ref, atol=2e-3, rtol=2e-3), "mismatch vs matched ref"
    ref32 = mlp_reference_fp32(x, params_f32)
    assert jnp.allclose(out, ref32, atol=1e-1, rtol=1e-1), "mismatch vs fp32 ref"

    # Larger batch: exercises the pipelined batch grid (2 tiles of 128 rows).
    key, kx2 = jax.random.split(key)
    B2 = 256
    x2 = jax.random.normal(kx2, (B2, INPUT_SIZE), jnp.float32)
    out2 = jax.block_until_ready(mlp_forward(x2, params_pad))
    assert out2.shape == (B2, OUTPUT_SIZE), out2.shape
    ref2 = mlp_reference_matched(x2, params_pad)
    assert jnp.allclose(out2, ref2, atol=2e-3, rtol=2e-3), "mismatch vs matched ref (B=256)"

    print("KERNEL_OK")
</pallas_src>

<mosaic_0001>
module attributes {stable_mosaic.version = 11 : i64} {
  func.func @_mlp_kernel(%arg0: i32, %arg1: memref<8x128xf32, #tpu.memory_space<vmem>>, %arg2: memref<128x128xbf16, #tpu.memory_space<vmem>>, %arg3: memref<1x128xf32, #tpu.memory_space<vmem>>, %arg4: memref<128x128xbf16, #tpu.memory_space<vmem>>, %arg5: memref<1x128xf32, #tpu.memory_space<vmem>>, %arg6: memref<128x128xbf16, #tpu.memory_space<vmem>>, %arg7: memref<1x128xf32, #tpu.memory_space<vmem>>, %arg8: memref<128x128xbf16, #tpu.memory_space<vmem>>, %arg9: memref<1x128xf32, #tpu.memory_space<vmem>>, %arg10: memref<128x128xbf16, #tpu.memory_space<vmem>>, %arg11: memref<1x128xf32, #tpu.memory_space<vmem>>, %arg12: memref<128x128xbf16, #tpu.memory_space<vmem>>, %arg13: memref<1x128xf32, #tpu.memory_space<vmem>>, %arg14: memref<8x128xf32, #tpu.memory_space<vmem>>) attributes {dimension_semantics = [#tpu.dimension_semantics<parallel>], iteration_bounds = array<i64: 1>, scalar_prefetch = 0 : i64, scratch_operands = 0 : i64, tpu.core_type = #tpu.core_type<tc>, window_params = [{transform_indices = @transform_0, window_bounds = array<i64: 8, 128>}, {pipeline_mode = #tpu.pipeline_mode<synchronous>, transform_indices = @transform_1, window_bounds = array<i64: 128, 128>}, {pipeline_mode = #tpu.pipeline_mode<synchronous>, transform_indices = @transform_2, window_bounds = array<i64: 1, 128>}, {pipeline_mode = #tpu.pipeline_mode<synchronous>, transform_indices = @transform_3, window_bounds = array<i64: 128, 128>}, {pipeline_mode = #tpu.pipeline_mode<synchronous>, transform_indices = @transform_4, window_bounds = array<i64: 1, 128>}, {pipeline_mode = #tpu.pipeline_mode<synchronous>, transform_indices = @transform_5, window_bounds = array<i64: 128, 128>}, {pipeline_mode = #tpu.pipeline_mode<synchronous>, transform_indices = @transform_6, window_bounds = array<i64: 1, 128>}, {pipeline_mode = #tpu.pipeline_mode<synchronous>, transform_indices = @transform_7, window_bounds = array<i64: 128, 128>}, {pipeline_mode = #tpu.pipeline_mode<synchronous>, transform_indices = @transform_8, window_bounds = array<i64: 1, 128>}, {pipeline_mode = #tpu.pipeline_mode<synchronous>, transform_indices = @transform_9, window_bounds = array<i64: 128, 128>}, {pipeline_mode = #tpu.pipeline_mode<synchronous>, transform_indices = @transform_10, window_bounds = array<i64: 1, 128>}, {pipeline_mode = #tpu.pipeline_mode<synchronous>, transform_indices = @transform_11, window_bounds = array<i64: 128, 128>}, {pipeline_mode = #tpu.pipeline_mode<synchronous>, transform_indices = @transform_12, window_bounds = array<i64: 1, 128>}, {transform_indices = @transform_13, window_bounds = array<i64: 8, 128>}]} {
    %c0 = arith.constant 0 : index
    %c0_0 = arith.constant 0 : index
    %0 = vector.load %arg1[%c0, %c0_0] : memref<8x128xf32, #tpu.memory_space<vmem>>, vector<8x128xf32>
    %1 = arith.truncf %0 : vector<8x128xf32> to vector<8x128xbf16>
    %c0_1 = arith.constant 0 : index
    %c0_2 = arith.constant 0 : index
    %2 = vector.load %arg2[%c0_1, %c0_2] : memref<128x128xbf16, #tpu.memory_space<vmem>>, vector<128x128xbf16>
    %cst = arith.constant dense<0.000000e+00> : vector<8x128xf32>
    %3 = tpu.matmul %1, %2, %cst {dimension_numbers = #tpu.dot_dimension_numbers<[1], [0], [0], [1], [0, 0, 1, 1], [], []>} : vector<8x128xbf16>, vector<128x128xbf16>, vector<8x128xf32> -> vector<8x128xf32>
    %c0_3 = arith.constant 0 : index
    %c0_4 = arith.constant 0 : index
    %4 = vector.load %arg3[%c0_3, %c0_4] : memref<1x128xf32, #tpu.memory_space<vmem>>, vector<1x128xf32>
    %5 = vector.broadcast %4 : vector<1x128xf32> to vector<8x128xf32>
    %6 = arith.addf %3, %5 : vector<8x128xf32>
    %cst_5 = arith.constant 0.000000e+00 : f32
    %7 = vector.broadcast %cst_5 : f32 to vector<8x128xf32>
    %8 = arith.maximumf %6, %7 : vector<8x128xf32>
    %9 = arith.truncf %8 : vector<8x128xf32> to vector<8x128xbf16>
    %c0_6 = arith.constant 0 : index
    %c0_7 = arith.constant 0 : index
    %10 = vector.load %arg4[%c0_6, %c0_7] : memref<128x128xbf16, #tpu.memory_space<vmem>>, vector<128x128xbf16>
    %cst_8 = arith.constant dense<0.000000e+00> : vector<8x128xf32>
    %11 = tpu.matmul %9, %10, %cst_8 {dimension_numbers = #tpu.dot_dimension_numbers<[1], [0], [0], [1], [0, 0, 1, 1], [], []>} : vector<8x128xbf16>, vector<128x128xbf16>, vector<8x128xf32> -> vector<8x128xf32>
    %c0_9 = arith.constant 0 : index
    %c0_10 = arith.constant 0 : index
    %12 = vector.load %arg5[%c0_9, %c0_10] : memref<1x128xf32, #tpu.memory_space<vmem>>, vector<1x128xf32>
    %13 = vector.broadcast %12 : vector<1x128xf32> to vector<8x128xf32>
    %14 = arith.addf %11, %13 : vector<8x128xf32>
    %cst_11 = arith.constant 0.000000e+00 : f32
    %15 = vector.broadcast %cst_11 : f32 to vector<8x128xf32>
    %16 = arith.maximumf %14, %15 : vector<8x128xf32>
    %17 = arith.truncf %16 : vector<8x128xf32> to vector<8x128xbf16>
    %c0_12 = arith.constant 0 : index
    %c0_13 = arith.constant 0 : index
    %18 = vector.load %arg6[%c0_12, %c0_13] : memref<128x128xbf16, #tpu.memory_space<vmem>>, vector<128x128xbf16>
    %cst_14 = arith.constant dense<0.000000e+00> : vector<8x128xf32>
    %19 = tpu.matmul %17, %18, %cst_14 {dimension_numbers = #tpu.dot_dimension_numbers<[1], [0], [0], [1], [0, 0, 1, 1], [], []>} : vector<8x128xbf16>, vector<128x128xbf16>, vector<8x128xf32> -> vector<8x128xf32>
    %c0_15 = arith.constant 0 : index
    %c0_16 = arith.constant 0 : index
    %20 = vector.load %arg7[%c0_15, %c0_16] : memref<1x128xf32, #tpu.memory_space<vmem>>, vector<1x128xf32>
    %21 = vector.broadcast %20 : vector<1x128xf32> to vector<8x128xf32>
    %22 = arith.addf %19, %21 : vector<8x128xf32>
    %cst_17 = arith.constant 0.000000e+00 : f32
    %23 = vector.broadcast %cst_17 : f32 to vector<8x128xf32>
    %24 = arith.maximumf %22, %23 : vector<8x128xf32>
    %25 = arith.truncf %24 : vector<8x128xf32> to vector<8x128xbf16>
    %c0_18 = arith.constant 0 : index
    %c0_19 = arith.constant 0 : index
    %26 = vector.load %arg8[%c0_18, %c0_19] : memref<128x128xbf16, #tpu.memory_space<vmem>>, vector<128x128xbf16>
    %cst_20 = arith.constant dense<0.000000e+00> : vector<8x128xf32>
    %27 = tpu.matmul %25, %26, %cst_20 {dimension_numbers = #tpu.dot_dimension_numbers<[1], [0], [0], [1], [0, 0, 1, 1], [], []>} : vector<8x128xbf16>, vector<128x128xbf16>, vector<8x128xf32> -> vector<8x128xf32>
    %c0_21 = arith.constant 0 : index
    %c0_22 = arith.constant 0 : index
    %28 = vector.load %arg9[%c0_21, %c0_22] : memref<1x128xf32, #tpu.memory_space<vmem>>, vector<1x128xf32>
    %29 = vector.broadcast %28 : vector<1x128xf32> to vector<8x128xf32>
    %30 = arith.addf %27, %29 : vector<8x128xf32>
    %cst_23 = arith.constant 0.000000e+00 : f32
    %31 = vector.broadcast %cst_23 : f32 to vector<8x128xf32>
    %32 = arith.maximumf %30, %31 : vector<8x128xf32>
    %33 = arith.truncf %32 : vector<8x128xf32> to vector<8x128xbf16>
    %c0_24 = arith.constant 0 : index
    %c0_25 = arith.constant 0 : index
    %34 = vector.load %arg10[%c0_24, %c0_25] : memref<128x128xbf16, #tpu.memory_space<vmem>>, vector<128x128xbf16>
    %cst_26 = arith.constant dense<0.000000e+00> : vector<8x128xf32>
    %35 = tpu.matmul %33, %34, %cst_26 {dimension_numbers = #tpu.dot_dimension_numbers<[1], [0], [0], [1], [0, 0, 1, 1], [], []>} : vector<8x128xbf16>, vector<128x128xbf16>, vector<8x128xf32> -> vector<8x128xf32>
    %c0_27 = arith.constant 0 : index
    %c0_28 = arith.constant 0 : index
    %36 = vector.load %arg11[%c0_27, %c0_28] : memref<1x128xf32, #tpu.memory_space<vmem>>, vector<1x128xf32>
    %37 = vector.broadcast %36 : vector<1x128xf32> to vector<8x128xf32>
    %38 = arith.addf %35, %37 : vector<8x128xf32>
    %cst_29 = arith.constant 0.000000e+00 : f32
    %39 = vector.broadcast %cst_29 : f32 to vector<8x128xf32>
    %40 = arith.maximumf %38, %39 : vector<8x128xf32>
    %41 = arith.truncf %40 : vector<8x128xf32> to vector<8x128xbf16>
    %c0_30 = arith.constant 0 : index
    %c0_31 = arith.constant 0 : index
    %42 = vector.load %arg12[%c0_30, %c0_31] : memref<128x128xbf16, #tpu.memory_space<vmem>>, vector<128x128xbf16>
    %cst_32 = arith.constant dense<0.000000e+00> : vector<8x128xf32>
    %43 = tpu.matmul %41, %42, %cst_32 {dimension_numbers = #tpu.dot_dimension_numbers<[1], [0], [0], [1], [0, 0, 1, 1], [], []>} : vector<8x128xbf16>, vector<128x128xbf16>, vector<8x128xf32> -> vector<8x128xf32>
    %c0_33 = arith.constant 0 : index
    %c0_34 = arith.constant 0 : index
    %44 = vector.load %arg13[%c0_33, %c0_34] : memref<1x128xf32, #tpu.memory_space<vmem>>, vector<1x128xf32>
    %45 = vector.broadcast %44 : vector<1x128xf32> to vector<8x128xf32>
    %46 = arith.addf %43, %45 : vector<8x128xf32>
    %c0_35 = arith.constant 0 : index
    %c0_36 = arith.constant 0 : index
    %47 = vector.load %arg14[%c0_35, %c0_36] : memref<8x128xf32, #tpu.memory_space<vmem>>, vector<8x128xf32>
    tpu.vector_store %arg14[%c0_35, %c0_36], %46 {strides = array<i32>} : memref<8x128xf32, #tpu.memory_space<vmem>>, vector<8x128xf32>,
    return
  }
  func.func @transform_0(%arg0: i32) -> (i32, i32) {
    %c0_i32 = arith.constant 0 : i32
    %c0_i32_0 = arith.constant 0 : i32
    return %arg0, %c0_i32 : i32, i32
  }
  func.func @transform_1(%arg0: i32) -> (i32, i32) {
    %c0_i32 = arith.constant 0 : i32
    %c0_i32_0 = arith.constant 0 : i32
    %c0_i32_1 = arith.constant 0 : i32
    return %c0_i32, %c0_i32_0 : i32, i32
  }
  func.func @transform_2(%arg0: i32) -> (i32, i32) {
    %c0_i32 = arith.constant 0 : i32
    %c0_i32_0 = arith.constant 0 : i32
    %c0_i32_1 = arith.constant 0 : i32
    return %c0_i32, %c0_i32_0 : i32, i32
  }
  func.func @transform_3(%arg0: i32) -> (i32, i32) {
    %c0_i32 = arith.constant 0 : i32
    %c0_i32_0 = arith.constant 0 : i32
    %c0_i32_1 = arith.constant 0 : i32
    return %c0_i32, %c0_i32_0 : i32, i32
  }
  func.func @transform_4(%arg0: i32) -> (i32, i32) {
    %c0_i32 = arith.constant 0 : i32
    %c0_i32_0 = arith.constant 0 : i32
    %c0_i32_1 = arith.constant 0 : i32
    return %c0_i32, %c0_i32_0 : i32, i32
  }
  func.func @transform_5(%arg0: i32) -> (i32, i32) {
    %c0_i32 = arith.constant 0 : i32
    %c0_i32_0 = arith.constant 0 : i32
    %c0_i32_1 = arith.constant 0 : i32
    return %c0_i32, %c0_i32_0 : i32, i32
  }
  func.func @transform_6(%arg0: i32) -> (i32, i32) {
    %c0_i32 = arith.constant 0 : i32
    %c0_i32_0 = arith.constant 0 : i32
    %c0_i32_1 = arith.constant 0 : i32
    return %c0_i32, %c0_i32_0 : i32, i32
  }
  func.func @transform_7(%arg0: i32) -> (i32, i32) {
    %c0_i32 = arith.constant 0 : i32
    %c0_i32_0 = arith.constant 0 : i32
    %c0_i32_1 = arith.constant 0 : i32
    return %c0_i32, %c0_i32_0 : i32, i32
  }
  func.func @transform_8(%arg0: i32) -> (i32, i32) {
    %c0_i32 = arith.constant 0 : i32
    %c0_i32_0 = arith.constant 0 : i32
    %c0_i32_1 = arith.constant 0 : i32
    return %c0_i32, %c0_i32_0 : i32, i32
  }
  func.func @transform_9(%arg0: i32) -> (i32, i32) {
    %c0_i32 = arith.constant 0 : i32
    %c0_i32_0 = arith.constant 0 : i32
    %c0_i32_1 = arith.constant 0 : i32
    return %c0_i32, %c0_i32_0 : i32, i32
  }
  func.func @transform_10(%arg0: i32) -> (i32, i32) {
    %c0_i32 = arith.constant 0 : i32
    %c0_i32_0 = arith.constant 0 : i32
    %c0_i32_1 = arith.constant 0 : i32
    return %c0_i32, %c0_i32_0 : i32, i32
  }
  func.func @transform_11(%arg0: i32) -> (i32, i32) {
    %c0_i32 = arith.constant 0 : i32
    %c0_i32_0 = arith.constant 0 : i32
    %c0_i32_1 = arith.constant 0 : i32
    return %c0_i32, %c0_i32_0 : i32, i32
  }
  func.func @transform_12(%arg0: i32) -> (i32, i32) {
    %c0_i32 = arith.constant 0 : i32
    %c0_i32_0 = arith.constant 0 : i32
    %c0_i32_1 = arith.constant 0 : i32
    return %c0_i32, %c0_i32_0 : i32, i32
  }
  func.func @transform_13(%arg0: i32) -> (i32, i32) {
    %c0_i32 = arith.constant 0 : i32
    %c0_i32_0 = arith.constant 0 : i32
    return %arg0, %c0_i32 : i32, i32
  }
}

</mosaic_0001>

<bundles_post_ra>
// kernel: tpu_custom_call.1
= control target key start
LH: loop header
LB: loop body
LE: loop exit
PB: predicated region body
PF: predicated region fallthrough
CT: control target
= control target key end

     0   :  { %18 = vsyncpa [#allocation3], 0  ;;  %s1269_s0 = inlined_call_operand.hbm [shape: f32[8,128], index: 0, kind: input, shape index: {}]   ;;  %s1270_s1 = inlined_call_operand.hbm [shape: bf16[128,128], index: 1, kind: input, shape index: {}]   ;;  %s1271_s2 = inlined_call_operand.vmem [shape: f32[1,128], index: 2, kind: input, shape index: {}]   ;;  %s1272_s3 = inlined_call_operand.hbm [shape: bf16[128,128], index: 3, kind: input, shape index: {}]   ;;  %s1273_s4 = inlined_call_operand.vmem [shape: f32[1,128], index: 4, kind: input, shape index: {}]   ;;  %s1274_s5 = inlined_call_operand.hbm [shape: bf16[128,128], index: 5, kind: input, shape index: {}]   ;;  %s1275_s6 = inlined_call_operand.vmem [shape: f32[1,128], index: 6, kind: input, shape index: {}]   ;;  %s1276_s7 = inlined_call_operand.hbm [shape: bf16[128,128], index: 7, kind: input, shape index: {}]   ;;  %s1277_s8 = inlined_call_operand.vmem [shape: f32[1,128], index: 8, kind: input, shape index: {}]   ;;  %s1278_s9 = inlined_call_operand.hbm [shape: bf16[128,128], index: 9, kind: input, shape index: {}]   ;;  %s1279_s10 = inlined_call_operand.vmem [shape: f32[1,128], index: 10, kind: input, shape index: {}]   ;;  %s1280_s11 = inlined_call_operand.hbm [shape: bf16[128,128], index: 11, kind: input, shape index: {}]   ;;  %s1281_s12 = inlined_call_operand.vmem [shape: f32[1,128], index: 12, kind: input, shape index: {}]   ;;  %s1282_s13 = inlined_call_operand.hbm [shape: f32[8,128], index: 13, kind: output, shape index: {}]  }
   0x1   :  { %19 = vsyncpa [#allocation6], 0 }
   0x2   :  { %20 = vsyncpa [#allocation9], 0 }
   0x3   :  { %21 = vsyncpa [#allocation12], 0  ;;  %s38_s27 = sshll.u32 %s1270_s1, 4  ;;  %s39_s27 = int_to_ptr.hbm [resolvable:$true] %s38_s27 }
   0x4   :  { %22 = vsyncpa [#allocation4], 0  ;;  %s1129_s28 = smov [#allocation5]   ;;  %s68_s15 = sshll.u32 %s1274_s5, 4  ;;  %s69_s15 = int_to_ptr.hbm [resolvable:$true] %s68_s15 }
   0x5   :  { %s40_s29 = sshll.u32 %s1129_s28, 4  ;;  %s1130_s16 = smov 64   ;;  %s41_s29 = int_to_ptr.vmem [resolvable:$true] %s40_s29 }
   0x6   :  { %s1131_s17 = smov 4   ;;  %s1132_s18 = smov [#allocation8]  }
   0x7   :  { %46 = dma.hbm_to_vmem [thread:$0]  %s39_s27, 1024, %s41_s29, [#allocation6], %s1130_s16, %s1130_s16, %s1131_s17  }
   0x8   :  { %s70_s19 = sshll.u32 %s1132_s18, 4  ;;  %s98_s21 = sshll.u32 %s1278_s9, 4  ;;  %s71_s19 = int_to_ptr.vmem [resolvable:$true] %s70_s19  ;;  %s99_s21 = int_to_ptr.hbm [resolvable:$true] %s98_s21 }
   0x9   :  { %76 = dma.hbm_to_vmem [thread:$0]  %s69_s15, 1024, %s71_s19, [#allocation9], %s1130_s16, %s1130_s16, %s1131_s17  }
   0xa   :  { %s28_s23 = sshll.u32 %s1269_s0, 4  ;;  %s1133_s24 = smov [#allocation11]   ;;  %s29_s23 = int_to_ptr.hbm [resolvable:$true] %s28_s23 }
   0xb   :  { %s100_s25 = sshll.u32 %s1133_s24, 4  ;;  %s1134_s26 = smov [#allocation2]   ;;  %s101_s25 = int_to_ptr.vmem [resolvable:$true] %s100_s25 }
   0xc   :  { %106 = dma.hbm_to_vmem [thread:$0]  %s99_s21, 1024, %s101_s25, [#allocation12], %s1130_s16, %s1130_s16, %s1131_s17  }
   0xd   :  { %s30_s9 = sshll.u32 %s1134_s26, 4  ;;  %s53_s29 = sshll.u32 %s1272_s3, 4  ;;  %s31_s9 = int_to_ptr.vmem [resolvable:$true] %s30_s9  ;;  %s54_s29 = int_to_ptr.hbm [resolvable:$true] %s53_s29 }
   0xe   :  { %33 = dma.hbm_to_vmem [thread:$0]  %s29_s23, 128, %s31_s9, [#allocation3]  }
   0xf   :  { %s83_s0 = sshll.u32 %s1276_s7, 4  ;;  %s1135_s15 = smov [#allocation7]   ;;  %s84_s0 = int_to_ptr.hbm [resolvable:$true] %s83_s0 }
  0x10   :  { %s55_s18 = sshll.u32 %s1135_s15, 4  ;;  %s1136_s19 = smov [#allocation10]   ;;  %s56_s18 = int_to_ptr.vmem [resolvable:$true] %s55_s18 }
  0x11   :  { %61 = dma.hbm_to_vmem [thread:$0]  %s54_s29, 1024, %s56_s18, [#allocation6], %s1130_s16, %s1130_s16, %s1131_s17  }
  0x12   :  { %s85_s20 = sshll.u32 %s1136_s19, 4  ;;  %s113_s3 = sshll.u32 %s1280_s11, 4  ;;  %s86_s20 = int_to_ptr.vmem [resolvable:$true] %s85_s20  ;;  %s114_s3 = int_to_ptr.hbm [resolvable:$true] %s113_s3 }
  0x13   :  { %91 = dma.hbm_to_vmem [thread:$0]  %s84_s0, 1024, %s86_s20, [#allocation9], %s1130_s16, %s1130_s16, %s1131_s17  }
  0x14   :  { %s1137_s7 = smov [#allocation13]  }
  0x15   :  { %s115_s5 = sshll.u32 %s1137_s7, 4  ;;  %s116_s5 = int_to_ptr.vmem [resolvable:$true] %s115_s5 }
  0x16   :  { %121 = dma.hbm_to_vmem [thread:$0]  %s114_s3, 1024, %s116_s5, [#allocation12], %s1130_s16, %s1130_s16, %s1131_s17  }
  0x17   :  { %1119 = dma.done.wait [#allocation3], 128  }
  0x18   :  { %1120 = vsyncadd [#allocation3], 4294967168 }
  0x19   :  { %1121 = dma.done.wait [#allocation6], 2048  }
  0x1a   :  { %1122 = vsyncadd [#allocation6], 4294965248 }
  0x1b   :  { %1123 = dma.done.wait [#allocation9], 2048  }
  0x1c   :  { %1124 = vsyncadd [#allocation9], 4294965248 }
  0x1d   :  { %1125 = dma.done.wait [#allocation12], 2048  }
  0x1e   :  { %1126 = vsyncadd [#allocation12], 4294965248  ;;  %v870_v0 = vld [vmem:[#allocation5 + $0x38] sm:$0xff]  ;;  %v869_v1 = vld [vmem:[#allocation5 + $0x30] sm:$0xff]  ;;  %s1138_s9 = smov [#allocation14]   ;;  %s658_s30 = sshll.u32 %s1282_s13, 4  ;;  %s659_s30 = int_to_ptr.hbm [resolvable:$true] %s658_s30 }
  0x1f   :  { %222 = vmatpush.bf16.msra.mxu0 %v870_v0  ;;  %v878_v2 = vld [vmem:[#allocation7 + $0x38] sm:$0xff]  ;;  %v868_v3 = vld [vmem:[#allocation5 + $0x28] sm:$0xff]  ;;  %v877_v4 = vld [vmem:[#allocation7 + $0x30] sm:$0xff]  ;;  %s656_s27 = sshll.u32 %s1138_s9, 4  ;;  %s657_s27 = int_to_ptr.vmem [resolvable:$true] %s656_s27 }
  0x20   :  { %305 = vmatpush.bf16.msra.mxu1 %v878_v2  ;;  %v876_v5 = vld [vmem:[#allocation7 + $0x28] sm:$0xff]  ;;  %v867_v6 = vld [vmem:[#allocation5 + $0x20] sm:$0xff]  ;;  %v866_v8 = vld [vmem:[#allocation5 + $0x18] sm:$0xff] }
  0x21   :  { %v875_v7 = vld [vmem:[#allocation7 + $0x20] sm:$0xff]  ;;  %v874_v9 = vld [vmem:[#allocation7 + $0x18] sm:$0xff]  ;;  %v865_v10 = vld [vmem:[#allocation5 + $0x10] sm:$0xff] }
  0x22   :  { %v873_v11 = vld [vmem:[#allocation7 + $0x10] sm:$0xff]  ;;  %v864_v12 = vld [vmem:[#allocation5 + $0x8] sm:$0xff]  ;;  %v863_v13 = vld [vmem:[#allocation5] sm:$0xff] }
  0x23   :  { %223 = vmatpush.bf16.msra.mxu0 %v869_v1  ;;  %v152_v14 = vld [vmem:[#allocation2] sm:$0xff]  ;;  %v872_v16 = vld [vmem:[#allocation7 + $0x8] sm:$0xff]  ;;  %v871_v17 = vld [vmem:[#allocation7] sm:$0xff] }
  0x24   :  { %306 = vmatpush.bf16.msra.mxu1 %v877_v4  ;;  %v153_v15 = vpack.c.bf16 %v152_v14, %v152_v14  ;;  %v886_v18 = vld [vmem:[#allocation8 + $0x38] sm:$0xff]  ;;  %v885_v19 = vld [vmem:[#allocation8 + $0x30] sm:$0xff]  ;;  %v884_v20 = vld [vmem:[#allocation8 + $0x28] sm:$0xff] }
  0x25   :  { %388 = vmatpush.bf16.msra.mxu2 %v886_v18  ;;  %v883_v21 = vld [vmem:[#allocation8 + $0x20] sm:$0xff]  ;;  %v882_v22 = vld [vmem:[#allocation8 + $0x18] sm:$0xff]  ;;  %v881_v23 = vld [vmem:[#allocation8 + $0x10] sm:$0xff] }
  0x26   :  { %v921_v24 = vld [vmem:[%s1271_s2] ss:$0 sm:$0xff]  ;;  %v880_v30 = vld [vmem:[#allocation8 + $0x8] sm:$0xff]  ;;  %v879_v31 = vld [vmem:[#allocation8] sm:$0xff] }
  0x27   :  { %224 = vmatpush.bf16.msra.mxu0 %v868_v3  ;;  %v894_v32 = vld [vmem:[#allocation10 + $0x38] sm:$0xff]  ;;  %v893_v33 = vld [vmem:[#allocation10 + $0x30] sm:$0xff]  ;;  %v892_v34 = vld [vmem:[#allocation10 + $0x28] sm:$0xff] }
  0x28   :  { %307 = vmatpush.bf16.msra.mxu1 %v876_v5  ;;  %471 = vmatpush.bf16.msra.mxu3 %v894_v32  ;;  %v891_v35 = vld [vmem:[#allocation10 + $0x20] sm:$0xff]  ;;  %v890_v36 = vld [vmem:[#allocation10 + $0x18] sm:$0xff]  ;;  %v889_v37 = vld [vmem:[#allocation10 + $0x10] sm:$0xff] }
  0x29   :  { %389 = vmatpush.bf16.msra.mxu2 %v885_v19  ;;  %v922_v38 = vld [vmem:[%s1273_s4] ss:$0 sm:$0xff]  ;;  %v888_v44 = vld [vmem:[#allocation10 + $0x8] sm:$0xff]  ;;  %v887_v45 = vld [vmem:[#allocation10] sm:$0xff] }
  0x2a   :  { %v902_v46 = vld [vmem:[#allocation11 + $0x38] sm:$0xff]  ;;  %v901_v47 = vld [vmem:[#allocation11 + $0x30] sm:$0xff]  ;;  %v900_v48 = vld [vmem:[#allocation11 + $0x28] sm:$0xff] }
  0x2b   :  { %225 = vmatpush.bf16.msra.mxu0 %v867_v6  ;;  %v899_v49 = vld [vmem:[#allocation11 + $0x20] sm:$0xff]  ;;  %v898_v50 = vld [vmem:[#allocation11 + $0x18] sm:$0xff]  ;;  %v897_v51 = vld [vmem:[#allocation11 + $0x10] sm:$0xff] }
  0x2c   :  { %308 = vmatpush.bf16.msra.mxu1 %v875_v7  ;;  %472 = vmatpush.bf16.msra.mxu3 %v893_v33  ;;  %v923_v52 = vld [vmem:[%s1275_s6] ss:$0 sm:$0xff]  ;;  %v896_v58 = vld [vmem:[#allocation11 + $0x8] sm:$0xff]  ;;  %v895_v59 = vld [vmem:[#allocation11] sm:$0xff] }
  0x2d   :  { %390 = vmatpush.bf16.msra.mxu2 %v884_v20  ;;  %v910_v60 = vld [vmem:[#allocation13 + $0x38] sm:$0xff]  ;;  %v909_v61 = vld [vmem:[#allocation13 + $0x30] sm:$0xff]  ;;  %v908_v62 = vld [vmem:[#allocation13 + $0x28] sm:$0xff] }
  0x2e   :  { %v907_v63 = vld [vmem:[#allocation13 + $0x20] sm:$0xff]  ;;  %v906_v0 = vld [vmem:[#allocation13 + $0x18] sm:$0xff]  ;;  %v905_v1 = vld [vmem:[#allocation13 + $0x10] sm:$0xff] }
  0x2f   :  { %226 = vmatpush.bf16.msra.mxu0 %v866_v8  ;;  %v924_v2 = vld [vmem:[%s1277_s8] ss:$0 sm:$0xff]  ;;  %v904_v8 = vld [vmem:[#allocation13 + $0x8] sm:$0xff] }
  0x30   :  { %309 = vmatpush.bf16.msra.mxu1 %v874_v9  ;;  %473 = vmatpush.bf16.msra.mxu3 %v892_v34  ;;  %v903_v9 = vld [vmem:[#allocation13] sm:$0xff] }
  0x31   :  { %391 = vmatpush.bf16.msra.mxu2 %v883_v21 }
  0x33   :  { %227 = vmatpush.bf16.msra.mxu0 %v865_v10  ;;  %v925_v10 = vld [vmem:[%s1279_s10] ss:$0 sm:$0xff] }
  0x34   :  { %310 = vmatpush.bf16.msra.mxu1 %v873_v11  ;;  %474 = vmatpush.bf16.msra.mxu3 %v891_v35 }
  0x35   :  { %392 = vmatpush.bf16.msra.mxu2 %v882_v22 }
  0x37   :  { %228 = vmatpush.bf16.msra.mxu0 %v864_v12 }
  0x38   :  { %311 = vmatpush.bf16.msra.mxu1 %v872_v16  ;;  %475 = vmatpush.bf16.msra.mxu3 %v890_v36  ;;  %v926_v16 = vld [vmem:[%s1281_s12] ss:$0 sm:$0xff] }
  0x39   :  { %393 = vmatpush.bf16.msra.mxu2 %v881_v23 }
  0x3b   :  { %229 = vmatpush.bf16.msra.mxu0 %v863_v13 }
  0x3c   :  { %312 = vmatpush.bf16.msra.mxu1 %v871_v17  ;;  %476 = vmatpush.bf16.msra.mxu3 %v889_v37 }
  0x3d   :  { %394 = vmatpush.bf16.msra.mxu2 %v880_v30 }
  0x3e   :  { %230 = vmatmul.bf16.vlgmr.msra.gmra.mxu0 %v153_v15 }
  0x3f   :  { %554 = vmatpush.bf16.msrb.mxu0 %v902_v46 }
  0x40   :  { %477 = vmatpush.bf16.msra.mxu3 %v888_v44  ;;  %637 = vmatpush.bf16.msrb.mxu1 %v910_v60 }
  0x41   :  { %395 = vmatpush.bf16.msra.mxu2 %v879_v31 }
  0x43   :  { %555 = vmatpush.bf16.msrb.mxu0 %v901_v47 }
  0x44   :  { %478 = vmatpush.bf16.msra.mxu3 %v887_v45  ;;  %638 = vmatpush.bf16.msrb.mxu1 %v909_v61 }
  0x47   :  { %556 = vmatpush.bf16.msrb.mxu0 %v900_v48 }
  0x48   :  { %639 = vmatpush.bf16.msrb.mxu1 %v908_v62 }
  0x4b   :  { %557 = vmatpush.bf16.msrb.mxu0 %v899_v49 }
  0x4c   :  { %640 = vmatpush.bf16.msrb.mxu1 %v907_v63 }
  0x4f   :  { %558 = vmatpush.bf16.msrb.mxu0 %v898_v50 }
  0x50   :  { %641 = vmatpush.bf16.msrb.mxu1 %v906_v0 }
  0x53   :  { %559 = vmatpush.bf16.msrb.mxu0 %v897_v51 }
  0x54   :  { %642 = vmatpush.bf16.msrb.mxu1 %v905_v1 }
  0x57   :  { %560 = vmatpush.bf16.msrb.mxu0 %v896_v58 }
  0x58   :  { %643 = vmatpush.bf16.msrb.mxu1 %v904_v8 }
  0x5b   :  { %561 = vmatpush.bf16.msrb.mxu0 %v895_v59 }
  0x5c   :  { %644 = vmatpush.bf16.msrb.mxu1 %v903_v9 }
  0xbb   :  { %v231_v25 = vpop.f32.mrf.mxu0 }
  0xbc   :  { %v232_v26 = vadd.f32 %v921_v24, %v231_v25 }
  0xbe   :  { %v235_v27 = vmax.f32 %v232_v26, 0.0 }
  0xc0   :  { %v236_v28 = vpack.c.bf16 %v235_v27, %v235_v27 }
  0xc2   :  { %313 = vmatmul.bf16.vlgmr.msra.gmra.mxu1 %v236_v28 }
  0xc3   :  { %v233_v29 = vpop.f32.mrf.mxu0 }
 0x13f   :  { %v314_v39 = vpop.f32.mrf.mxu1 }
 0x140   :  { %v315_v40 = vadd.f32 %v922_v38, %v314_v39 }
 0x142   :  { %v318_v41 = vmax.f32 %v315_v40, 0.0 }
 0x144   :  { %v319_v42 = vpack.c.bf16 %v318_v41, %v318_v41 }
 0x146   :  { %396 = vmatmul.bf16.vlgmr.msra.gmra.mxu2 %v319_v42 }
 0x147   :  { %v316_v43 = vpop.f32.mrf.mxu1 }
 0x1c9   :  { %v397_v53 = vpop.f32.mrf.mxu2 }
 0x1ca   :  { %v398_v54 = vadd.f32 %v923_v52, %v397_v53 }
 0x1cc   :  { %v401_v55 = vmax.f32 %v398_v54, 0.0 }
 0x1ce   :  { %v402_v56 = vpack.c.bf16 %v401_v55, %v401_v55 }
 0x1d0   :  { %479 = vmatmul.bf16.vlgmr.msra.gmra.mxu3 %v402_v56 }
 0x1d1   :  { %v399_v57 = vpop.f32.mrf.mxu2 }
 0x253   :  { %v480_v3 = vpop.f32.mrf.mxu3 }
 0x254   :  { %v481_v4 = vadd.f32 %v924_v2, %v480_v3 }
 0x256   :  { %v484_v5 = vmax.f32 %v481_v4, 0.0 }
 0x258   :  { %v485_v6 = vpack.c.bf16 %v484_v5, %v484_v5 }
 0x25a   :  { %562 = vmatmul.bf16.vlgmr.msrb.gmra.mxu0 %v485_v6 }
 0x25b   :  { %v482_v7 = vpop.f32.mrf.mxu3 }
 0x2d7   :  { %v563_v11 = vpop.f32.mrf.mxu0 }
 0x2d8   :  { %v564_v12 = vadd.f32 %v925_v10, %v563_v11 }
 0x2da   :  { %v567_v13 = vmax.f32 %v564_v12, 0.0 }
 0x2dc   :  { %v568_v14 = vpack.c.bf16 %v567_v13, %v567_v13 }
 0x2de   :  { %645 = vmatmul.bf16.vlgmr.msrb.gmra.mxu1 %v568_v14 }
 0x2df   :  { %v565_v15 = vpop.f32.mrf.mxu0 }
 0x35b   :  { %v646_v17 = vpop.f32.mrf.mxu1 }
 0x35c   :  { %v647_v18 = vadd.f32 %v926_v16, %v646_v17 }
 0x35e   :  { %650 = vst [vmem:[#allocation14] sm:$0xff] %v647_v18 }
 0x35f   :  { %661 = dma.vmem_to_hbm [thread:$0]  %s657_s27, 128, %s659_s30, [#allocation4]  }
 0x363   :  { %v648_v19 = vpop.f32.mrf.mxu1 }
 0x364   :  { %1127 = dma.done.wait [#allocation4], 128  }
 0x365   :  { %1128 = vsyncadd [#allocation4], 4294967168 }
 0x366   :  { %666 = vsyncpa [#allocation3], 1 }
 0x367   :  { %667 = vsyncpa [#allocation6], 1 }
 0x368   :  { %668 = vsyncpa [#allocation9], 1 }
 0x369   :  { %669 = vsyncpa [#allocation12], 1 }
 0x36a   :  { %670 = vsyncpa [#allocation4], 1 }

</bundles_post_ra>
